<compile_context>
chip_gen: v7x
topology: tpu7x:2x2x1
jax: 0.10.0
libtpu: 0.0.40
codegen_flags: <defaults>
</compile_context>

<pallas_src>
import functools

import jax
import jax.numpy as jnp
from jax.experimental import pallas as pl
from jax.experimental.pallas import tpu as pltpu


def _round_up(x, m):
    return (x + m - 1) // m * m


def _categorical_target_kernel(*refs, activation, has_bias, use_acc, x_resident, tk):
    idx = 0
    x_ref = refs[idx]; idx += 1
    w_ref = refs[idx]; idx += 1
    b_ref = None
    if has_bias:
        b_ref = refs[idx]; idx += 1
    o_ref = refs[idx]; idx += 1
    acc_ref = refs[idx] if use_acc else o_ref  # f32 output accumulates in place

    k = pl.program_id(2)

    @pl.when(k == 0)
    def _():
        acc_ref[...] = jnp.zeros_like(acc_ref)

    if x_resident:
        # x slab holds the full (padded) hidden axis; slice the current K tile.
        x_tile = x_ref[:, pl.ds(pl.multiple_of(k * tk, tk), tk)]
    else:
        x_tile = x_ref[...]

    # Plain NN contraction: x (tm, tk) @ w_T (tk, tn) -> f32 accumulate on MXU.
    acc_ref[...] += jnp.dot(x_tile, w_ref[...], preferred_element_type=jnp.float32)

    if has_bias or (activation is not None) or use_acc:
        @pl.when(k == pl.num_programs(2) - 1)
        def _():
            out = acc_ref[...]
            if has_bias:
                out = out + b_ref[...]  # (1, tn) broadcast over batch rows
            if activation is not None:
                # NOTE: only elementwise activations are correct per-(tm, tn) tile.
                # TODO(synk): a softmax-over-classes activation would need an
                # online (running max/sum) epilogue once the class dim is tiled,
                # and masking of the padded class columns.
                out = activation(out)
            o_ref[...] = out.astype(o_ref.dtype)


class CategoricalTargetKernel:
    """Forward pass of merlin CategoricalTarget: y = x @ W.T (+ b), optional activation.

    Parameters (weight/bias) are padded, cast to the MXU feed dtype, and
    transposed ONCE at construction time, so the per-call cost is the matmul
    kernel itself plus (if needed) an input pad/cast.
    """

    def __init__(self, weight, bias=None, activation=None, mxu_dtype="auto",
                 w_buffers=2):
        C, H = weight.shape
        self.num_classes = C
        self.hidden = H
        self.activation = activation
        self.has_bias = bias is not None
        self.w_buffers = int(w_buffers)

        if mxu_dtype == "auto":
            # Feed the MXU at bf16 rate (f32 accumulation) when params are f32.
            feed = jnp.bfloat16 if weight.dtype == jnp.float32 else weight.dtype
        elif mxu_dtype is None:
            feed = weight.dtype
        else:
            feed = mxu_dtype
        self.feed_dtype = jnp.dtype(feed)

        # Lane-dense class (N) tile; multiple of 256 when >128 so the v6e/v7x
        # 256x256 MXU stays full.  K tile multiple of 128.
        tn = _round_up(min(C, 512), 128)
        if tn > 128:
            tn = min(512, _round_up(tn, 256))
        tk = min(512, _round_up(H, 128))
        self.tn, self.tk = tn, tk
        self.C_pad = _round_up(C, tn)
        self.H_pad = _round_up(H, tk)

        # One-time pad + cast + transpose of the weight to [H_pad, C_pad].
        self.w_t = (
            jnp.zeros((self.H_pad, self.C_pad), self.feed_dtype)
            .at[:H, :C]
            .set(weight.astype(self.feed_dtype).T)
        )
        if self.has_bias:
            self.b2d = (
                jnp.zeros((1, self.C_pad), jnp.float32)
                .at[0, :C]
                .set(bias.astype(jnp.float32))
            )
        else:
            self.b2d = None

    def __call__(self, inputs, return_padded=False):
        B, H = inputs.shape
        assert H == self.hidden, "hidden dim mismatch"
        out_dtype = inputs.dtype
        feed = self.feed_dtype
        itemsize = feed.itemsize
        C = self.num_classes
        C_pad, H_pad, tn, tk = self.C_pad, self.H_pad, self.tn, self.tk

        # Batch tile aligned to the sublane pack of the feed dtype.
        pack = {4: 8, 2: 16, 1: 32}.get(itemsize, 8)
        tm = min(512, _round_up(B, pack))
        B_pad = _round_up(B, tm)

        x = inputs.astype(feed)
        if (B_pad, H_pad) != (B, H):
            x = jnp.zeros((B_pad, H_pad), feed).at[:B, :H].set(x)

        # Keep the activation slab resident across the class/reduction axes
        # whenever its double-buffered footprint fits a modest budget.
        x_resident = tm * H_pad * itemsize * 2 <= (16 << 20)
        # f32 output -> accumulate straight into the (k-resident) output block.
        use_acc = out_dtype != jnp.float32

        if x_resident:
            x_spec = pl.BlockSpec((tm, H_pad), lambda i, j, k: (i, 0))
        else:
            x_spec = pl.BlockSpec((tm, tk), lambda i, j, k: (i, k))

        if self.w_buffers > 2:
            w_spec = pl.BlockSpec((tk, tn), lambda i, j, k: (k, j),
                                  pipeline_mode=pl.Buffered(self.w_buffers))
        else:
            w_spec = pl.BlockSpec((tk, tn), lambda i, j, k: (k, j))

        in_specs = [x_spec, w_spec]
        args = [x, self.w_t]
        if self.has_bias:
            in_specs.append(pl.BlockSpec((1, tn), lambda i, j, k: (0, j)))
            args.append(self.b2d)

        scratch = [pltpu.VMEM((tm, tn), jnp.float32)] if use_acc else []

        # VMEM budget: estimate the double-buffered footprint, clamp to 48 MiB
        # (safe on all generations incl. v7x's 64 MiB physical VMEM).
        wbuf = max(2, self.w_buffers)
        est = (tm * (H_pad if x_resident else tk) * itemsize * 2
               + tk * tn * itemsize * wbuf
               + tm * tn * jnp.dtype(out_dtype).itemsize * 2
               + (tm * tn * 4 if use_acc else 0)
               + (8 * tn * 4 * 2 if self.has_bias else 0))
        vmem_limit = int(min(max(2 * est, 32 << 20), 48 << 20))

        cost = pl.CostEstimate(
            flops=2 * B_pad * H_pad * C_pad,
            transcendentals=0,
            bytes_accessed=(B_pad * H_pad + C_pad * H_pad) * itemsize
            + B_pad * C_pad * jnp.dtype(out_dtype).itemsize
            + (C_pad * 4 if self.has_bias else 0),
        )

        kernel = functools.partial(
            _categorical_target_kernel,
            activation=self.activation,
            has_bias=self.has_bias,
            use_acc=use_acc,
            x_resident=x_resident,
            tk=tk,
        )

        out = pl.pallas_call(
            kernel,
            out_shape=jax.ShapeDtypeStruct((B_pad, C_pad), out_dtype),
            grid_spec=pltpu.PrefetchScalarGridSpec(
                num_scalar_prefetch=0,
                grid=(B_pad // tm, C_pad // tn, H_pad // tk),
                in_specs=in_specs,
                out_specs=pl.BlockSpec((tm, tn), lambda i, j, k: (i, j)),
                scratch_shapes=scratch,
            ),
            compiler_params=pltpu.CompilerParams(
                dimension_semantics=("parallel", "parallel", "arbitrary"),
                vmem_limit_bytes=vmem_limit,
            ),
            cost_estimate=cost,
        )(*args)

        if not return_padded and (B_pad != B or C_pad != C):
            out = out[:B, :C]
        return out


def categorical_target_forward(inputs, weight, bias=None, activation=None,
                               mxu_dtype="auto"):
    """One-shot functional wrapper (prefer CategoricalTargetKernel to hoist the
    per-parameter pad/cast/transpose out of the steady-state call path)."""
    return CategoricalTargetKernel(weight, bias, activation, mxu_dtype)(inputs)


if __name__ == "__main__":
    # Synthetic module config: int_domain.max = 11 -> num_classes = 12.
    batch, hidden, num_classes = 8, 32, 12

    key = jax.random.PRNGKey(0)
    k_x, k_w, k_b = jax.random.split(key, 3)

    # Deterministic "LazyLinear" parameter init (uniform like PyTorch default).
    bound = 1.0 / (hidden ** 0.5)
    x = jax.random.normal(k_x, (batch, hidden), dtype=jnp.float32)
    weight = jax.random.uniform(
        k_w, (num_classes, hidden), dtype=jnp.float32, minval=-bound, maxval=bound
    )
    bias = jax.random.uniform(
        k_b, (num_classes,), dtype=jnp.float32, minval=-bound, maxval=bound
    )

    ref = x @ weight.T + bias

    # Default path: bf16 MXU feed, f32 accumulation (activation=None, bias=True).
    head = CategoricalTargetKernel(weight, bias, activation=None)  # params prepared once
    out = jax.block_until_ready(head(x))
    assert out.shape == (batch, num_classes)
    assert jnp.allclose(out, ref, atol=3e-2, rtol=3e-2), "mismatch (bf16 feed)"

    # Exact-numerics path (mxu_dtype=None keeps f32 end to end).
    out_f32 = jax.block_until_ready(
        categorical_target_forward(x, weight, bias, activation=None, mxu_dtype=None)
    )
    assert jnp.allclose(out_f32, ref, atol=1e-5, rtol=1e-5), "mismatch (f32 feed)"

    # bias=False constructor path: no bias input DMA'd at all.
    out_nb = jax.block_until_ready(
        categorical_target_forward(x, weight, bias=None, activation=None, mxu_dtype=None)
    )
    assert jnp.allclose(out_nb, x @ weight.T, atol=1e-5, rtol=1e-5), "mismatch (no bias)"

    # TODO(synk): embedding_lookup / should_apply_contrastive are training-time
    # helpers (index_select on weights / batch state), not part of forward().
    print("KERNEL_OK")
</pallas_src>

<mosaic_0001>
module attributes {stable_mosaic.version = 11 : i64} {
  func.func @_categorical_target_kernel(%arg0: i32, %arg1: i32, %arg2: i32, %arg3: memref<16x128xbf16, #tpu.memory_space<vmem>>, %arg4: memref<128x128xbf16, #tpu.memory_space<vmem>>, %arg5: memref<1x128xf32, #tpu.memory_space<vmem>>, %arg6: memref<16x128xf32, #tpu.memory_space<vmem>>) attributes {dimension_semantics = [#tpu.dimension_semantics<parallel>, #tpu.dimension_semantics<parallel>, #tpu.dimension_semantics<arbitrary>], iteration_bounds = array<i64: 1, 1, 1>, scalar_prefetch = 0 : i64, scratch_operands = 0 : i64, tpu.core_type = #tpu.core_type<tc>, window_params = [{transform_indices = @transform_0, window_bounds = array<i64: 16, 128>}, {transform_indices = @transform_1, window_bounds = array<i64: 128, 128>}, {transform_indices = @transform_2, window_bounds = array<i64: 1, 128>}, {transform_indices = @transform_3, window_bounds = array<i64: 16, 128>}]} {
    %c0_i32 = arith.constant 0 : i32
    %0 = arith.cmpi eq, %arg2, %c0_i32 : i32
    %1 = arith.extui %0 : i1 to i32
    %c0_i32_0 = arith.constant 0 : i32
    %2 = arith.cmpi ne, %1, %c0_i32_0 : i32
    scf.if %2 {
      %cst_9 = arith.constant 0.000000e+00 : f32
      %15 = vector.broadcast %cst_9 : f32 to vector<16x128xf32>
      %c0_10 = arith.constant 0 : index
      %c0_11 = arith.constant 0 : index
      %16 = vector.load %arg6[%c0_10, %c0_11] : memref<16x128xf32, #tpu.memory_space<vmem>>, vector<16x128xf32>
      tpu.vector_store %arg6[%c0_10, %c0_11], %15 {strides = array<i32>} : memref<16x128xf32, #tpu.memory_space<vmem>>, vector<16x128xf32>,
    } else {
    }
    %c128_i32 = arith.constant 128 : i32
    %3 = arith.muli %arg2, %c128_i32 : i32
    %4 = tpu.assume_multiple %3, 128 : i32
    %c0 = arith.constant 0 : index
    %5 = arith.index_cast %4 : i32 to index
    %6 = vector.load %arg3[%c0, %5] : memref<16x128xbf16, #tpu.memory_space<vmem>>, vector<16x128xbf16>
    %c0_1 = arith.constant 0 : index
    %c0_2 = arith.constant 0 : index
    %7 = vector.load %arg6[%c0_1, %c0_2] : memref<16x128xf32, #tpu.memory_space<vmem>>, vector<16x128xf32>
    %c0_3 = arith.constant 0 : index
    %c0_4 = arith.constant 0 : index
    %8 = vector.load %arg4[%c0_3, %c0_4] : memref<128x128xbf16, #tpu.memory_space<vmem>>, vector<128x128xbf16>
    %cst = arith.constant dense<0.000000e+00> : vector<16x128xf32>
    %9 = tpu.matmul %6, %8, %cst {dimension_numbers = #tpu.dot_dimension_numbers<[1], [0], [0], [1], [0, 0, 1, 1], [], []>} : vector<16x128xbf16>, vector<128x128xbf16>, vector<16x128xf32> -> vector<16x128xf32>
    %10 = arith.addf %7, %9 : vector<16x128xf32>
    %c0_5 = arith.constant 0 : index
    %c0_6 = arith.constant 0 : index
    %11 = vector.load %arg6[%c0_5, %c0_6] : memref<16x128xf32, #tpu.memory_space<vmem>>, vector<16x128xf32>
    tpu.vector_store %arg6[%c0_5, %c0_6], %10 {strides = array<i32>} : memref<16x128xf32, #tpu.memory_space<vmem>>, vector<16x128xf32>,
    %c0_i32_7 = arith.constant 0 : i32
    %12 = arith.cmpi eq, %arg2, %c0_i32_7 : i32
    %13 = arith.extui %12 : i1 to i32
    %c0_i32_8 = arith.constant 0 : i32
    %14 = arith.cmpi ne, %13, %c0_i32_8 : i32
    scf.if %14 {
      %c0_9 = arith.constant 0 : index
      %c0_10 = arith.constant 0 : index
      %15 = vector.load %arg6[%c0_9, %c0_10] : memref<16x128xf32, #tpu.memory_space<vmem>>, vector<16x128xf32>
      %c0_11 = arith.constant 0 : index
      %c0_12 = arith.constant 0 : index
      %16 = vector.load %arg5[%c0_11, %c0_12] : memref<1x128xf32, #tpu.memory_space<vmem>>, vector<1x128xf32>
      %17 = vector.broadcast %16 : vector<1x128xf32> to vector<16x128xf32>
      %18 = arith.addf %15, %17 : vector<16x128xf32>
      %c0_13 = arith.constant 0 : index
      %c0_14 = arith.constant 0 : index
      %19 = vector.load %arg6[%c0_13, %c0_14] : memref<16x128xf32, #tpu.memory_space<vmem>>, vector<16x128xf32>
      tpu.vector_store %arg6[%c0_13, %c0_14], %18 {strides = array<i32>} : memref<16x128xf32, #tpu.memory_space<vmem>>, vector<16x128xf32>,
    } else {
    }
    return
  }
  func.func @transform_0(%arg0: i32, %arg1: i32, %arg2: i32) -> (i32, i32) {
    %c0_i32 = arith.constant 0 : i32
    %c0_i32_0 = arith.constant 0 : i32
    return %arg0, %c0_i32 : i32, i32
  }
  func.func @transform_1(%arg0: i32, %arg1: i32, %arg2: i32) -> (i32, i32) {
    %c0_i32 = arith.constant 0 : i32
    return %arg2, %arg1 : i32, i32
  }
  func.func @transform_2(%arg0: i32, %arg1: i32, %arg2: i32) -> (i32, i32) {
    %c0_i32 = arith.constant 0 : i32
    %c0_i32_0 = arith.constant 0 : i32
    return %c0_i32, %arg1 : i32, i32
  }
  func.func @transform_3(%arg0: i32, %arg1: i32, %arg2: i32) -> (i32, i32) {
    %c0_i32 = arith.constant 0 : i32
    return %arg0, %arg1 : i32, i32
  }
}

</mosaic_0001>

<bundles_post_ra>
// kernel: tpu_custom_call.1
= control target key start
LH: loop header
LB: loop body
LE: loop exit
PB: predicated region body
PF: predicated region fallthrough
CT: control target
= control target key end

     0   :  { %8 = vsyncpa [#allocation3], 0  ;;  %s407_s0 = inlined_call_operand.hbm [shape: bf16[16,128], index: 0, kind: input, shape index: {}]   ;;  %s408_s1 = inlined_call_operand.hbm [shape: bf16[128,128], index: 1, kind: input, shape index: {}]   ;;  %s409_s2 = inlined_call_operand.vmem [shape: f32[1,128], index: 2, kind: input, shape index: {}]   ;;  %s410_s3 = inlined_call_operand.hbm [shape: f32[16,128], index: 3, kind: output, shape index: {}]  }
   0x1   :  { %9 = vsyncpa [#allocation6], 0 }
   0x2   :  { %10 = vsyncpa [#allocation4], 0  ;;  %s339_s12 = smov [#allocation2]   ;;  %s267_s16 = scalar_lea.hbm %s407_s0, 128 }
   0x3   :  { %s16_s13 = sshll.u32 %s339_s12, 4  ;;  %p268_p0 = scmp.ne.s32.totalorder %s407_s0, %s267_s16  ;;  %s17_s13 = int_to_ptr.vmem [resolvable:$true] %s16_s13 }
   0x4   :  { %p271_p1 = scmp.lt.u32.totalorder %s267_s16, %s407_s0 }
   0x6   :  { %p273_p2 = pnand %p271_p1, %p268_p0 }
   0x8   :  { %276 = shalt.err (!%p273_p2)
}
   0x9   :  { %s277_s21 = scalar_lea.vmem %s17_s13, 128  ;;  %p282_p4 = scmp.lt.s32.totalorder %s17_s13, %s17_s13 }
   0xa   :  { %p278_p3 = scmp.ne.s32.totalorder %s17_s13, %s277_s21  ;;  %p283_p5 = scmp.lt.s32.totalorder %s277_s21, %s277_s21 }
   0xc   :  { %p284_p6 = por %p283_p5, %p282_p4 }
   0xe   :  { %p285_p7 = pnand %p284_p6, %p278_p3 }
  0x10   :  { %288 = shalt.err (!%p285_p7)
}
  0x11   :  { %s340_s22 = smov 64   ;;  %s341_s23 = smov 4  }
  0x12   :  { %22 = dma.hbm_to_vmem [thread:$0]  %s407_s0, 128, %s17_s13, [#allocation3], %s340_s22, %s340_s22, %s341_s23  }
  0x13   :  { %s342_s26 = smov [#allocation5]   ;;  %s289_s30 = scalar_lea.hbm %s408_s1, 1024 }
  0x14   :  { %s28_s27 = sshll.u32 %s342_s26, 4  ;;  %p290_p8 = scmp.ne.s32.totalorder %s408_s1, %s289_s30  ;;  %s29_s27 = int_to_ptr.vmem [resolvable:$true] %s28_s27 }
  0x15   :  { %p293_p9 = scmp.lt.u32.totalorder %s289_s30, %s408_s1 }
  0x17   :  { %p295_p10 = pnand %p293_p9, %p290_p8 }
  0x19   :  { %298 = shalt.err (!%p295_p10)
}
  0x1a   :  { %s299_s8 = scalar_lea.vmem %s29_s27, 1024  ;;  %p304_p12 = scmp.lt.s32.totalorder %s29_s27, %s29_s27 }
  0x1b   :  { %p300_p11 = scmp.ne.s32.totalorder %s29_s27, %s299_s8  ;;  %p305_p13 = scmp.lt.s32.totalorder %s299_s8, %s299_s8 }
  0x1d   :  { %p306_p0 = por %p305_p13, %p304_p12 }
  0x1f   :  { %p307_p1 = pnand %p306_p0, %p300_p11 }
  0x21   :  { %310 = shalt.err (!%p307_p1)
}
  0x22   :  { %34 = dma.hbm_to_vmem [thread:$0]  %s408_s1, 1024, %s29_s27, [#allocation6], %s340_s22, %s340_s22, %s341_s23  }
  0x23   :  { %333 = dma.done.wait [#allocation3], 128  }
  0x24   :  { %334 = vsyncadd [#allocation3], 4294967168 }
  0x25   :  { %335 = dma.done.wait [#allocation6], 1024  }
  0x26   :  { %336 = vsyncadd [#allocation6], 4294966272  ;;  %v343_v0 = vmov 0.0   ;;  %vm344_vm0 = vmmov 0   ;;  %v258_v1 = vld [vmem:[#allocation5] sm:$0xff]   ;;  %v259_v2 = vld [vmem:[#allocation5 + $0x8] sm:$0xff]  }
  0x27   :  { %229 = vmatprep.subr.bf16.mxu0 %v343_v0  ;;  %245 = vmatprep.mubr.msk.bf16.mxu0 %vm344_vm0, %v343_v0  ;;  %v260_v3 = vld [vmem:[#allocation5 + $0x10] sm:$0xff]   ;;  %v261_v4 = vld [vmem:[#allocation5 + $0x18] sm:$0xff]   ;;  %v262_v5 = vld [vmem:[#allocation5 + $0x20] sm:$0xff]   ;;  %s345_s11 = smov [#allocation7]  }
  0x28   :  { %230 = vmatpush3.bf16.msra.mxu0 %v258_v1  ;;  %v263_v6 = vld [vmem:[#allocation5 + $0x28] sm:$0xff]   ;;  %v264_v7 = vld [vmem:[#allocation5 + $0x30] sm:$0xff]   ;;  %v265_v8 = vld [vmem:[#allocation5 + $0x38] sm:$0xff]   ;;  %s195_s12 = sshll.u32 %s345_s11, 4  ;;  %s196_s12 = int_to_ptr.vmem [resolvable:$true] %s195_s12 }
  0x29   :  { %231 = vmatprep.subr.bf16.mxu0 %v343_v0  ;;  %v266_v9 = vld [vmem:[#allocation2] sm:$0xff]   ;;  %s311_s13 = scalar_lea.vmem %s196_s12, 256  ;;  %p316_p3 = scmp.lt.s32.totalorder %s196_s12, %s196_s12 }
  0x2a   :  { %v219_v11 = vld [vmem:[%s409_s2] ss:$0 sm:$0xff]  ;;  %p312_p2 = scmp.ne.s32.totalorder %s196_s12, %s311_s13  ;;  %p317_p4 = scmp.lt.s32.totalorder %s311_s13, %s311_s13 }
  0x2c   :  { %232 = vmatpush3.bf16.msra.mxu0 %v259_v2  ;;  %p318_p5 = por %p317_p4, %p316_p3 }
  0x2d   :  { %233 = vmatprep.subr.bf16.mxu0 %v343_v0 }
  0x2e   :  { %p319_p6 = pnand %p318_p5, %p312_p2 }
  0x30   :  { %234 = vmatpush3.bf16.msra.mxu0 %v260_v3 }
  0x31   :  { %235 = vmatprep.subr.bf16.mxu0 %v343_v0 }
  0x34   :  { %236 = vmatpush3.bf16.msra.mxu0 %v261_v4 }
  0x35   :  { %237 = vmatprep.subr.bf16.mxu0 %v343_v0 }
  0x38   :  { %238 = vmatpush3.bf16.msra.mxu0 %v262_v5 }
  0x39   :  { %239 = vmatprep.subr.bf16.mxu0 %v343_v0 }
  0x3c   :  { %240 = vmatpush3.bf16.msra.mxu0 %v263_v6 }
  0x3d   :  { %241 = vmatprep.subr.bf16.mxu0 %v343_v0 }
  0x40   :  { %242 = vmatpush3.bf16.msra.mxu0 %v264_v7 }
  0x41   :  { %243 = vmatprep.subr.bf16.mxu0 %v343_v0 }
  0x44   :  { %244 = vmatpush3.bf16.msra.mxu0 %v265_v8 }
  0x47   :  { %246 = vmatmul.mubr.bf16.vlgmr.msra.gmra.mrb[0].mxu0 %v266_v9 }
 0x11a   :  { %v163_v10 = vpop.f32.mrb[0].mxu0 }
 0x11b   :  { %v247_v12 = vpop.f32.mrb[1].mxu0  ;;  %v186_v15 = vadd.f32 %v219_v11, %v163_v10 }
 0x11c   :  { %v166_v13 = vpop.f32.mrb[2].mxu0 }
 0x11d   :  { %v248_v14 = vpop.f32.mrb[3].mxu0  ;;  %v187_v16 = vadd.f32 %v219_v11, %v166_v13  ;;  %188 = vst [vmem:[#allocation7] sm:$0xff] %v186_v15 }
 0x11f   :  { %189 = vst [vmem:[#allocation7 + $0x8] sm:$0xff] %v187_v16 }
 0x120   :  { %322 = shalt.err (!%p319_p6)
}
 0x121   :  { %s323_s2 = scalar_lea.hbm %s410_s3, 256 }
 0x122   :  { %p324_p7 = scmp.ne.s32.totalorder %s410_s3, %s323_s2  ;;  %p327_p8 = scmp.lt.u32.totalorder %s323_s2, %s410_s3 }
 0x124   :  { %p329_p9 = pnand %p327_p8, %p324_p7 }
 0x126   :  { %332 = shalt.err (!%p329_p9)
}
 0x127   :  { %s346_s20 = smov 128   ;;  %s347_s21 = smov 8  }
 0x128   :  { %201 = dma.vmem_to_hbm [thread:$0]  %s196_s12, 256, %s410_s3, [#allocation4], %s346_s20, %s346_s20, %s347_s21  }
 0x129   :  { %337 = dma.done.wait [#allocation4], 256  }
 0x12a   :  { %338 = vsyncadd [#allocation4], 4294967040 }
 0x12b   :  { %205 = vsyncpa [#allocation3], 1 }
 0x12c   :  { %206 = vsyncpa [#allocation6], 1 }
 0x12d   :  { %207 = vsyncpa [#allocation4], 1 }

</bundles_post_ra>
